<compile_context>
chip_gen: v6e
topology: v6e:2x2x1
jax: 0.10.0
libtpu: 0.0.40
codegen_flags: <defaults>
</compile_context>

<pallas_src>
import functools
import math

import jax
import jax.numpy as jnp
from jax.experimental import pallas as pl
from jax.experimental.pallas import tpu as pltpu


def _round_up(x, m):
    return (x + m - 1) // m * m


def _pad2(a, rows, cols):
    return jnp.pad(a, ((0, rows - a.shape[0]), (0, cols - a.shape[1])))


def _vmem_limit_bytes():
    # v5e/v6e: 128 MiB physical -> ~96 MiB; v7x: 64 MiB physical -> 48 MiB.
    cap = 128 * 1024 * 1024
    try:
        cap = int(getattr(pltpu.get_tpu_info(), "vmem_capacity_bytes", cap))
    except Exception:
        pass
    return min(100 * 1024 * 1024, (cap * 3) // 4)


def _choose_tiles(N, tile_i, tile_k):
    npad128 = _round_up(N, 128)
    if tile_i is None:
        if npad128 < 256:
            tile_i = npad128
        else:
            # keep >= 2 row tiles so the "parallel" i axis balances v7x's two TCs
            tile_i = min(512, max(128, (npad128 // 2) // 128 * 128))
    if tile_k is None:
        tile_k = min(2048, npad128)
    n_pad = _round_up(N, math.lcm(tile_i, tile_k))
    return tile_i, tile_k, n_pad


# ---------------------------------------------------------------------------
# Kernel 1: feature projection  P1 = d^{-1/2} * (X @ W1)  -> bf16
# ---------------------------------------------------------------------------
def _project_kernel(x_ref, w_ref, d_ref, p_ref):
    xw = jnp.dot(x_ref[...], w_ref[...], preferred_element_type=jnp.float32)
    p_ref[...] = (d_ref[...] * xw).astype(p_ref.dtype)


def _project(x_p, w_p, dinv_p, tile_i, vmem_limit):
    n_pad, f_in = x_p.shape
    f_out = w_p.shape[1]
    return pl.pallas_call(
        _project_kernel,
        out_shape=jax.ShapeDtypeStruct((n_pad, f_out), jnp.bfloat16),
        grid=(n_pad // tile_i,),
        in_specs=[
            pl.BlockSpec((tile_i, f_in), lambda i: (i, 0)),
            pl.BlockSpec((f_in, f_out), lambda i: (0, 0)),
            pl.BlockSpec((tile_i, 1), lambda i: (i, 0)),
        ],
        out_specs=pl.BlockSpec((tile_i, f_out), lambda i: (i, 0)),
        compiler_params=pltpu.CompilerParams(
            dimension_semantics=("parallel",),
            vmem_limit_bytes=vmem_limit,
        ),
    )(x_p, w_p, dinv_p)


# ---------------------------------------------------------------------------
# Kernel 2: layer-1 aggregation with fused ReLU + layer-2 projection epilogue
#   acc = Â @ P1 (bf16 MXU, f32 acc);  h1 = relu(d*acc + b1);
#   P2  = d * (h1 @ W2)   -> bf16 output
# ---------------------------------------------------------------------------
def _agg1_kernel(adj_ref, p_ref, d_ref, b_ref, w2_ref, p2_ref, acc_ref, *, tile_k):
    k = pl.program_id(1)

    @pl.when(k == 0)
    def _():
        acc_ref[...] = jnp.zeros_like(acc_ref)

    # int8 (exact 0/1) -> bf16; P1 slice from resident VMEM block; bf16 MXU matmul.
    a = adj_ref[...].astype(jnp.bfloat16)
    row0 = pl.multiple_of(k * tile_k, tile_k)
    ps = p_ref[pl.ds(row0, tile_k), :]
    acc_ref[...] += jnp.dot(a, ps, preferred_element_type=jnp.float32)

    @pl.when(k == pl.num_programs(1) - 1)
    def _():
        h = jnp.maximum(d_ref[...] * acc_ref[...] + b_ref[...], 0.0)
        # dropout between the layers is identity in eval mode
        p2 = d_ref[...] * jnp.dot(h, w2_ref[...], preferred_element_type=jnp.float32)
        p2_ref[...] = p2.astype(p2_ref.dtype)


def _aggregate1(adj_i8, p1, dinv_p, b1, w2, tile_i, tile_k, vmem_limit):
    n_pad = adj_i8.shape[0]
    fh = p1.shape[1]
    fc = w2.shape[1]
    kernel = functools.partial(_agg1_kernel, tile_k=tile_k)
    return pl.pallas_call(
        kernel,
        out_shape=jax.ShapeDtypeStruct((n_pad, fc), jnp.bfloat16),
        grid=(n_pad // tile_i, n_pad // tile_k),
        in_specs=[
            pl.BlockSpec((tile_i, tile_k), lambda i, k: (i, k)),   # Â tile (int8)
            pl.BlockSpec((n_pad, fh), lambda i, k: (0, 0)),        # P1 resident
            pl.BlockSpec((tile_i, 1), lambda i, k: (i, 0)),        # d^{-1/2} rows
            pl.BlockSpec((1, fh), lambda i, k: (0, 0)),            # b1
            pl.BlockSpec((fh, fc), lambda i, k: (0, 0)),           # W2 (fused proj)
        ],
        out_specs=pl.BlockSpec((tile_i, fc), lambda i, k: (i, 0)),
        scratch_shapes=[pltpu.VMEM((tile_i, fh), jnp.float32)],
        compiler_params=pltpu.CompilerParams(
            dimension_semantics=("parallel", "arbitrary"),
            vmem_limit_bytes=vmem_limit,
        ),
    )(adj_i8, p1, dinv_p, b1, w2)


# ---------------------------------------------------------------------------
# Kernel 3: layer-2 aggregation with fused masked log_softmax epilogue.
#   Accumulates directly into the resident f32 output block (no scratch).
# ---------------------------------------------------------------------------
def _agg2_kernel(adj_ref, p_ref, d_ref, b_ref, o_ref, *, tile_k, valid_cols):
    k = pl.program_id(1)

    @pl.when(k == 0)
    def _():
        o_ref[...] = jnp.zeros_like(o_ref)

    a = adj_ref[...].astype(jnp.bfloat16)
    row0 = pl.multiple_of(k * tile_k, tile_k)
    ps = p_ref[pl.ds(row0, tile_k), :]
    o_ref[...] += jnp.dot(a, ps, preferred_element_type=jnp.float32)

    @pl.when(k == pl.num_programs(1) - 1)
    def _():
        h = d_ref[...] * o_ref[...] + b_ref[...]
        # Only the first `valid_cols` lanes are real classes (rest is padding).
        col = jax.lax.broadcasted_iota(jnp.int32, h.shape, 1)
        valid = col < valid_cols
        m = jnp.max(jnp.where(valid, h, -jnp.inf), axis=1, keepdims=True)
        s = jnp.sum(jnp.where(valid, jnp.exp(h - m), 0.0), axis=1, keepdims=True)
        o_ref[...] = h - (m + jnp.log(s))


def _aggregate2(adj_i8, p2, dinv_p, b2, tile_i, tile_k, valid_cols, vmem_limit):
    n_pad = adj_i8.shape[0]
    fc = p2.shape[1]
    kernel = functools.partial(_agg2_kernel, tile_k=tile_k, valid_cols=valid_cols)
    return pl.pallas_call(
        kernel,
        out_shape=jax.ShapeDtypeStruct((n_pad, fc), jnp.float32),
        grid=(n_pad // tile_i, n_pad // tile_k),
        in_specs=[
            pl.BlockSpec((tile_i, tile_k), lambda i, k: (i, k)),   # Â tile (int8)
            pl.BlockSpec((n_pad, fc), lambda i, k: (0, 0)),        # P2 resident
            pl.BlockSpec((tile_i, 1), lambda i, k: (i, 0)),        # d^{-1/2} rows
            pl.BlockSpec((1, fc), lambda i, k: (0, 0)),            # b2
        ],
        out_specs=pl.BlockSpec((tile_i, fc), lambda i, k: (i, 0)),
        compiler_params=pltpu.CompilerParams(
            dimension_semantics=("parallel", "arbitrary"),
            vmem_limit_bytes=vmem_limit,
        ),
    )(adj_i8, p2, dinv_p, b2)


# ---------------------------------------------------------------------------
# Forward pass wrapper
# ---------------------------------------------------------------------------
def init_params(key, nfeat, nhid, nclass):
    k1, k2, k3, k4 = jax.random.split(key, 4)

    def glorot(k, fi, fo):
        limit = jnp.sqrt(6.0 / (fi + fo))
        return jax.random.uniform(k, (fi, fo), jnp.float32, -limit, limit)

    return {
        "W1": glorot(k1, nfeat, nhid),
        "b1": 0.1 * jax.random.normal(k2, (nhid,), jnp.float32),
        "W2": glorot(k3, nhid, nclass),
        "b2": 0.1 * jax.random.normal(k4, (nclass,), jnp.float32),
    }


def gnnguard_forward(x, adj, params, *, tile_i=None, tile_k=None):
    """x: [N, nfeat] f32; adj: [N, N] f32 dense symmetric 0/1 adjacency with
    self loops (the self-loop-augmented adjacency GNNGuard.fit builds)."""
    N, nfeat = x.shape
    nhid = params["W1"].shape[1]
    nclass = params["W2"].shape[1]

    tile_i, tile_k, n_pad = _choose_tiles(N, tile_i, tile_k)
    fi = _round_up(nfeat, 128)
    fh = _round_up(nhid, 128)
    fc = _round_up(nclass, 128)
    vmem_limit = _vmem_limit_bytes()

    # GCN symmetric normalization factors (kept in f32; deg==0 -> 0, as in norm()).
    deg = jnp.sum(adj, axis=1)
    dinv = jnp.where(deg > 0.0, 1.0 / jnp.sqrt(deg), 0.0).astype(jnp.float32)

    # int8 adjacency is exact only because edge weights are strictly 0/1 here
    # (attention=False path); see TODO at the top of the file.
    adj_i8 = _pad2(adj, n_pad, n_pad).astype(jnp.int8)
    dinv_p = _pad2(dinv[:, None], n_pad, 1)
    x_p = _pad2(x, n_pad, fi).astype(jnp.bfloat16)
    w1 = _pad2(params["W1"], fi, fh).astype(jnp.bfloat16)
    b1 = _pad2(params["b1"][None, :], 1, fh)
    w2 = _pad2(params["W2"], fh, fc)                 # f32 (tiny epilogue matmul)
    b2 = _pad2(params["b2"][None, :], 1, fc)

    # gc1 projection
    p1 = _project(x_p, w1, dinv_p, tile_i, vmem_limit)
    # gc1 aggregation + ReLU + (eval-mode dropout) + fused gc2 projection
    p2 = _aggregate1(adj_i8, p1, dinv_p, b1, w2, tile_i, tile_k, vmem_limit)
    # gc2 aggregation + masked log_softmax
    out = _aggregate2(adj_i8, p2, dinv_p, b2, tile_i, tile_k, nclass, vmem_limit)
    return out[:N, :nclass]


def gnnguard_reference(x, adj, params):
    """Pure-JAX f32 reference of the same forward pass."""
    deg = jnp.sum(adj, axis=1)
    dinv = jnp.where(deg > 0.0, 1.0 / jnp.sqrt(deg), 0.0)
    S = dinv[:, None] * adj * dinv[None, :]
    h = S @ (x @ params["W1"]) + params["b1"]
    h = jnp.maximum(h, 0.0)
    o = S @ (h @ params["W2"]) + params["b2"]
    return jax.nn.log_softmax(o, axis=1)


if __name__ == "__main__":
    def run_case(key, N, nfeat, nhid, nclass, p_edge, tile_i, tile_k):
        kx, ka, kp = jax.random.split(key, 3)
        x = jax.random.normal(kx, (N, nfeat), jnp.float32)
        adj = (jax.random.uniform(ka, (N, N)) < p_edge).astype(jnp.float32)
        adj = jnp.maximum(adj, adj.T)                           # symmetric
        adj = jnp.maximum(adj, jnp.eye(N, dtype=jnp.float32))   # add self loops
        params = init_params(kp, nfeat, nhid, nclass)

        out = gnnguard_forward(x, adj, params, tile_i=tile_i, tile_k=tile_k)
        out = jax.block_until_ready(out)

        ref = gnnguard_reference(x, adj, params)
        assert out.shape == (N, nclass)
        assert bool(jnp.all(jnp.isfinite(out)))
        err = float(jnp.max(jnp.abs(out - ref)))
        # bf16 MXU feed (X/W1/P1/P2 in bf16, f32 accumulation) -> relaxed tolerance
        # vs the pure-f32 reference, as flagged in the perf review.
        assert jnp.allclose(out, ref, atol=2e-2, rtol=2e-2), err
        # rows of a log_softmax must exponentiate-sum to 1 (computed in f32)
        assert jnp.allclose(jnp.sum(jnp.exp(out), axis=1), 1.0, atol=1e-4)

    key = jax.random.PRNGKey(0)
    k1, k2 = jax.random.split(key)
    # tiny case: single-block (degenerate grid), odd small dims, default tiles
    run_case(k1, N=12, nfeat=16, nhid=32, nclass=4, p_edge=0.3,
             tile_i=None, tile_k=None)
    # tiled case: 3x3 grid exercises the accumulator / pl.when init+finalize,
    # the resident-P in-kernel pl.ds slicing, the fused relu+projection epilogue
    # and the masked log_softmax over the padded class dim (7 -> 128)
    run_case(k2, N=384, nfeat=64, nhid=32, nclass=7, p_edge=0.05,
             tile_i=128, tile_k=128)

    print("KERNEL_OK")
</pallas_src>

<mosaic_0001>
module attributes {stable_mosaic.version = 11 : i64} {
  func.func @_project_kernel(%arg0: i32, %arg1: memref<128x128xbf16, #tpu.memory_space<vmem>>, %arg2: memref<128x128xbf16, #tpu.memory_space<vmem>>, %arg3: memref<128x1xf32, #tpu.memory_space<vmem>>, %arg4: memref<128x128xbf16, #tpu.memory_space<vmem>>) attributes {dimension_semantics = [#tpu.dimension_semantics<parallel>], iteration_bounds = array<i64: 1>, scalar_prefetch = 0 : i64, scratch_operands = 0 : i64, tpu.core_type = #tpu.core_type<tc>, window_params = [{transform_indices = @transform_0, window_bounds = array<i64: 128, 128>}, {pipeline_mode = #tpu.pipeline_mode<synchronous>, transform_indices = @transform_1, window_bounds = array<i64: 128, 128>}, {transform_indices = @transform_2, window_bounds = array<i64: 128, 1>}, {transform_indices = @transform_3, window_bounds = array<i64: 128, 128>}]} {
    %c0 = arith.constant 0 : index
    %c0_0 = arith.constant 0 : index
    %0 = vector.load %arg1[%c0, %c0_0] : memref<128x128xbf16, #tpu.memory_space<vmem>>, vector<128x128xbf16>
    %c0_1 = arith.constant 0 : index
    %c0_2 = arith.constant 0 : index
    %1 = vector.load %arg2[%c0_1, %c0_2] : memref<128x128xbf16, #tpu.memory_space<vmem>>, vector<128x128xbf16>
    %cst = arith.constant dense<0.000000e+00> : vector<128x128xf32>
    %2 = tpu.matmul %0, %1, %cst {dimension_numbers = #tpu.dot_dimension_numbers<[1], [0], [0], [1], [0, 0, 1, 1], [], []>} : vector<128x128xbf16>, vector<128x128xbf16>, vector<128x128xf32> -> vector<128x128xf32>
    %c0_3 = arith.constant 0 : index
    %c0_4 = arith.constant 0 : index
    %3 = vector.load %arg3[%c0_3, %c0_4] : memref<128x1xf32, #tpu.memory_space<vmem>>, vector<128x1xf32>
    %4 = vector.broadcast %3 : vector<128x1xf32> to vector<128x128xf32>
    %5 = arith.mulf %4, %2 : vector<128x128xf32>
    %6 = arith.truncf %5 : vector<128x128xf32> to vector<128x128xbf16>
    %c0_5 = arith.constant 0 : index
    %c0_6 = arith.constant 0 : index
    %7 = vector.load %arg4[%c0_5, %c0_6] : memref<128x128xbf16, #tpu.memory_space<vmem>>, vector<128x128xbf16>
    tpu.vector_store %arg4[%c0_5, %c0_6], %6 {strides = array<i32>} : memref<128x128xbf16, #tpu.memory_space<vmem>>, vector<128x128xbf16>,
    return
  }
  func.func @transform_0(%arg0: i32) -> (i32, i32) {
    %c0_i32 = arith.constant 0 : i32
    %c0_i32_0 = arith.constant 0 : i32
    return %arg0, %c0_i32 : i32, i32
  }
  func.func @transform_1(%arg0: i32) -> (i32, i32) {
    %c0_i32 = arith.constant 0 : i32
    %c0_i32_0 = arith.constant 0 : i32
    %c0_i32_1 = arith.constant 0 : i32
    return %c0_i32, %c0_i32_0 : i32, i32
  }
  func.func @transform_2(%arg0: i32) -> (i32, i32) {
    %c0_i32 = arith.constant 0 : i32
    %c0_i32_0 = arith.constant 0 : i32
    return %arg0, %c0_i32 : i32, i32
  }
  func.func @transform_3(%arg0: i32) -> (i32, i32) {
    %c0_i32 = arith.constant 0 : i32
    %c0_i32_0 = arith.constant 0 : i32
    return %arg0, %c0_i32 : i32, i32
  }
}

</mosaic_0001>

<bundles_post_ra>
// kernel: tpu_custom_call.1
= control target key start
LH: loop header
LB: loop body
LE: loop exit
PB: predicated region body
PF: predicated region fallthrough
CT: control target
= control target key end

     0   :  { %v652_v2 = vmov 0   ;;  %s775_s0 = inlined_call_operand.vmem [shape: bf16[128,128], index: 0, kind: input, shape index: {}]   ;;  %s776_s1 = inlined_call_operand.vmem [shape: bf16[128,128], index: 1, kind: input, shape index: {}]   ;;  %s777_s2 = inlined_call_operand.vmem [shape: f32[128,1], index: 2, kind: input, shape index: {}]   ;;  %s778_s3 = inlined_call_operand.hbm [shape: bf16[128,128], index: 3, kind: output, shape index: {}]  }
   0x1   :  { %v614_v0 = vld [vmem:[%s776_s1 + $0x38] sm:$0xff]   ;;  %v615_v1 = vld [vmem:[%s776_s1 + $0x30] sm:$0xff]   ;;  %613 = vset.pattern.permute.xlu1 %v652_v2  ;;  %612 = vset.pattern.permute.xlu0 %v652_v2  ;;  %v616_v3 = vld [vmem:[%s776_s1 + $0x28] sm:$0xff]  }
   0x2   :  { %560 = vmatprep.subr.bf16.mxu0 %v614_v0  ;;  %592 = vmatprep.subr.bf16.mxu1 %v614_v0  ;;  %v617_v4 = vld [vmem:[%s776_s1 + $0x20] sm:$0xff]   ;;  %v618_v7 = vld [vmem:[%s776_s1 + $0x18] sm:$0xff]   ;;  %v619_v8 = vld [vmem:[%s776_s1 + $0x10] sm:$0xff]  }
   0x3   :  { %561 = vmatpush3.bf16.msra.mxu0 %v614_v0  ;;  %600 = vmatpush3.bf16.msra.mxu1 %v614_v0  ;;  %v622_v5 = vld [vmem:[%s775_s0] sm:$0xff]   ;;  %v243_v9 = vld [vmem:[%s777_s2 + $0x10] sm:$0xff]  ;;  %v244_v11 = vld [vmem:[%s777_s2 + $0x18] sm:$0xff] }
   0x4   :  { %562 = vmatprep.subr.bf16.mxu0 %v615_v1  ;;  %593 = vmatprep.subr.bf16.mxu1 %v615_v1  ;;  %v623_v6 = vld [vmem:[%s775_s0 + $0x20] sm:$0xff]   ;;  %v242_v12 = vld [vmem:[%s777_s2 + $0x8] sm:$0xff] }
   0x5   :  { %576 = vmatprep.mubr.bf16.mxu0 %v622_v5  ;;  %584 = vmatprep.mubr.bf16.mxu1 %v623_v6  ;;  %v241_v10 = vld [vmem:[%s777_s2] sm:$0xff]  ;;  %v620_v13 = vld [vmem:[%s776_s1 + $0x8] sm:$0xff]  }
   0x6   :  { %269 = vperm.xlu1 %613, %v243_v9   ;;  %259 = vperm.xlu0 %612, %v241_v10  }
   0x7   :  { %563 = vmatpush3.bf16.msra.mxu0 %v615_v1  ;;  %601 = vmatpush3.bf16.msra.mxu1 %v615_v1 }
   0x8   :  { %564 = vmatprep.subr.bf16.mxu0 %v616_v3  ;;  %594 = vmatprep.subr.bf16.mxu1 %v616_v3 }
   0xa   :  { %274 = vperm.xlu1 %613, %v244_v11   ;;  %264 = vperm.xlu0 %612, %v242_v12  }
   0xb   :  { %565 = vmatpush3.bf16.msra.mxu0 %v616_v3  ;;  %602 = vmatpush3.bf16.msra.mxu1 %v616_v3 }
   0xc   :  { %566 = vmatprep.subr.bf16.mxu0 %v617_v4  ;;  %595 = vmatprep.subr.bf16.mxu1 %v617_v4 }
   0xf   :  { %567 = vmatpush3.bf16.msra.mxu0 %v617_v4  ;;  %603 = vmatpush3.bf16.msra.mxu1 %v617_v4 }
  0x10   :  { %568 = vmatprep.subr.bf16.mxu0 %v618_v7  ;;  %596 = vmatprep.subr.bf16.mxu1 %v618_v7 }
  0x13   :  { %569 = vmatpush3.bf16.msra.mxu0 %v618_v7  ;;  %604 = vmatpush3.bf16.msra.mxu1 %v618_v7 }
  0x14   :  { %570 = vmatprep.subr.bf16.mxu0 %v619_v8  ;;  %597 = vmatprep.subr.bf16.mxu1 %v619_v8 }
  0x15   :  { %8 = vsyncpa [#allocation3], 0  ;;  %v246_v14 = vld [vmem:[%s777_s2 + $0x28] sm:$0xff]  ;;  %v245_v15 = vld [vmem:[%s777_s2 + $0x20] sm:$0xff] }
  0x16   :  { %v621_v16 = vld [vmem:[%s776_s1] sm:$0xff]   ;;  %284 = vperm.xlu1 %613, %v246_v14   ;;  %279 = vperm.xlu0 %612, %v245_v15   ;;  %v248_v17 = vld [vmem:[%s777_s2 + $0x38] sm:$0xff]  ;;  %v247_v18 = vld [vmem:[%s777_s2 + $0x30] sm:$0xff] }
  0x17   :  { %571 = vmatpush3.bf16.msra.mxu0 %v619_v8  ;;  %605 = vmatpush3.bf16.msra.mxu1 %v619_v8  ;;  %v624_v19 = vld [vmem:[%s775_s0 + $0x8] sm:$0xff]   ;;  %v249_v22 = vld [vmem:[%s777_s2 + $0x40] sm:$0xff]  ;;  %v626_v23 = vld [vmem:[%s775_s0 + $0x10] sm:$0xff]  }
  0x18   :  { %572 = vmatprep.subr.bf16.mxu0 %v620_v13  ;;  %598 = vmatprep.subr.bf16.mxu1 %v620_v13  ;;  %v625_v20 = vld [vmem:[%s775_s0 + $0x28] sm:$0xff]   ;;  %v627_v24 = vld [vmem:[%s775_s0 + $0x30] sm:$0xff]   ;;  %v252_v25 = vld [vmem:[%s777_s2 + $0x58] sm:$0xff] }
  0x19   :  { %v250_v21 = vld [vmem:[%s777_s2 + $0x48] sm:$0xff]  ;;  %v251_v26 = vld [vmem:[%s777_s2 + $0x50] sm:$0xff]  ;;  %v628_v27 = vld [vmem:[%s775_s0 + $0x18] sm:$0xff]  }
  0x1a   :  { %294 = vperm.xlu1 %613, %v248_v17   ;;  %289 = vperm.xlu0 %612, %v247_v18   ;;  %v629_v28 = vld [vmem:[%s775_s0 + $0x38] sm:$0xff]   ;;  %v254_v29 = vld [vmem:[%s777_s2 + $0x68] sm:$0xff]  ;;  %v253_v30 = vld [vmem:[%s777_s2 + $0x60] sm:$0xff]  ;;  %s653_s0 = smov [#allocation2]  }
  0x1b   :  { %573 = vmatpush3.bf16.msra.mxu0 %v620_v13  ;;  %606 = vmatpush3.bf16.msra.mxu1 %v620_v13  ;;  %v256_v31 = vld [vmem:[%s777_s2 + $0x78] sm:$0xff]  ;;  %v255_v32 = vld [vmem:[%s777_s2 + $0x70] sm:$0xff]  ;;  %s438_s2 = sshll.u32 %s653_s0, 4  ;;  %s439_s2 = int_to_ptr.vmem [resolvable:$true] %s438_s2 }
  0x1c   :  { %574 = vmatprep.subr.bf16.mxu0 %v621_v16  ;;  %599 = vmatprep.subr.bf16.mxu1 %v621_v16  ;;  %s630_s21 = scalar_lea.vmem %s439_s2, 1024  ;;  %p635_p1 = scmp.lt.s32.totalorder %s439_s2, %s439_s2 }
  0x1d   :  { %p631_p0 = scmp.ne.s32.totalorder %s439_s2, %s630_s21  ;;  %p636_p2 = scmp.lt.s32.totalorder %s630_s21, %s630_s21 }
  0x1e   :  { %304 = vperm.xlu1 %613, %v250_v21   ;;  %299 = vperm.xlu0 %612, %v249_v22  }
  0x1f   :  { %575 = vmatpush3.bf16.msra.mxu0 %v621_v16  ;;  %607 = vmatpush3.bf16.msra.mxu1 %v621_v16  ;;  %p637_p3 = por %p636_p2, %p635_p1 }
  0x21   :  { %p638_p4 = pnand %p637_p3, %p631_p0 }
  0x22   :  { %577 = vmatmul.mubr.bf16.vlgmr.msra.gmra.mxu0 %v624_v19  ;;  %585 = vmatmul.mubr.bf16.vlgmr.msra.gmra.mxu1 %v625_v20 }
  0x23   :  { %580 = vmatprep.mubr.bf16.mxu0 %v626_v23  ;;  %588 = vmatprep.mubr.bf16.mxu1 %v627_v24 }
  0x24   :  { %314 = vperm.xlu1 %613, %v252_v25   ;;  %309 = vperm.xlu0 %612, %v251_v26  }
  0x28   :  { %324 = vperm.xlu1 %613, %v254_v29   ;;  %319 = vperm.xlu0 %612, %v253_v30  }
  0x2a   :  { %581 = vmatmul.mubr.bf16.gmra.mxu0 %v628_v27  ;;  %589 = vmatmul.mubr.bf16.gmra.mxu1 %v629_v28 }
  0x2c   :  { %334 = vperm.xlu1 %613, %v256_v31   ;;  %329 = vperm.xlu0 %612, %v255_v32  }
  0x81   :  { %v270_v33 = vpop.permute.xlu1 %269  ;;  %v260_v34 = vpop.permute.xlu0 %259 }
  0x85   :  { %v275_v35 = vpop.permute.xlu1 %274  ;;  %v265_v36 = vpop.permute.xlu0 %264 }
  0x91   :  { %v285_v37 = vpop.permute.xlu1 %284  ;;  %v280_v38 = vpop.permute.xlu0 %279 }
  0x95   :  { %v295_v39 = vpop.permute.xlu1 %294  ;;  %v290_v40 = vpop.permute.xlu0 %289 }
  0x99   :  { %v305_v41 = vpop.permute.xlu1 %304  ;;  %v300_v42 = vpop.permute.xlu0 %299 }
  0x9f   :  { %v315_v43 = vpop.permute.xlu1 %314  ;;  %v310_v44 = vpop.permute.xlu0 %309 }
  0xa3   :  { %v325_v51 = vpop.permute.xlu1 %324  ;;  %v320_v52 = vpop.permute.xlu0 %319 }
  0xa7   :  { %v335_v7 = vpop.permute.xlu1 %334  ;;  %v330_v8 = vpop.permute.xlu0 %329 }
  0xe2   :  { %v578_v45 = vpop.f32.mrf.mxu0  ;;  %v586_v46 = vpop.f32.mrf.mxu1 }
  0xe3   :  { %v339_v53 = vmul.f32 %v578_v45, %v270_v33  ;;  %v347_v54 = vmul.f32 %v586_v46, %v310_v44 }
  0xe4   :  { %v178_v47 = vpop.f32.mrf.mxu0  ;;  %v210_v48 = vpop.f32.mrf.mxu1 }
  0xe5   :  { %v337_v57 = vmul.f32 %v260_v34, %v178_v47  ;;  %v345_v58 = vmul.f32 %v300_v42, %v210_v48 }
  0xe6   :  { %v579_v49 = vpop.f32.mrf.mxu0  ;;  %v587_v50 = vpop.f32.mrf.mxu1 }
  0xe7   :  { %v340_v55 = vmul.f32 %v579_v49, %v275_v35  ;;  %v348_v56 = vmul.f32 %v587_v50, %v315_v43 }
  0xe8   :  { %v181_v59 = vpop.f32.mrf.mxu0  ;;  %v213_v60 = vpop.f32.mrf.mxu1 }
  0xe9   :  { %v505_v61 = vpack.c.bf16 %v340_v55, %v339_v53  ;;  %v525_v62 = vpack.c.bf16 %v348_v56, %v347_v54  ;;  %v338_v63 = vmul.f32 %v265_v36, %v181_v59  ;;  %v346_v0 = vmul.f32 %v305_v41, %v213_v60 }
  0xea   :  { %v582_v1 = vpop.f32.mrf.mxu0  ;;  %v590_v2 = vpop.f32.mrf.mxu1 }
  0xeb   :  { %537 = vst [vmem:[#allocation2 + $0x8] sm:$0xff] %v505_v61   ;;  %541 = vst [vmem:[#allocation2 + $0x28] sm:$0xff] %v525_v62   ;;  %v500_v3 = vpack.c.bf16 %v338_v63, %v337_v57  ;;  %v520_v4 = vpack.c.bf16 %v346_v0, %v345_v58  ;;  %v343_v11 = vmul.f32 %v582_v1, %v290_v40 }
  0xec   :  { %v194_v5 = vpop.f32.mrf.mxu0  ;;  %v226_v6 = vpop.f32.mrf.mxu1  ;;  %v351_v12 = vmul.f32 %v590_v2, %v330_v8 }
  0xed   :  { %501 = vst [vmem:[#allocation2] sm:$0xff] %v500_v3   ;;  %540 = vst [vmem:[#allocation2 + $0x20] sm:$0xff] %v520_v4   ;;  %v341_v15 = vmul.f32 %v280_v38, %v194_v5  ;;  %v349_v16 = vmul.f32 %v320_v52, %v226_v6 }
  0xee   :  { %v583_v9 = vpop.f32.mrf.mxu0  ;;  %v591_v10 = vpop.f32.mrf.mxu1 }
  0xef   :  { %v344_v13 = vmul.f32 %v583_v9, %v295_v39  ;;  %v352_v14 = vmul.f32 %v591_v10, %v335_v7 }
  0xf0   :  { %v197_v17 = vpop.f32.mrf.mxu0  ;;  %v229_v18 = vpop.f32.mrf.mxu1 }
  0xf1   :  { %v515_v19 = vpack.c.bf16 %v344_v13, %v343_v11  ;;  %v535_v20 = vpack.c.bf16 %v352_v14, %v351_v12  ;;  %v342_v21 = vmul.f32 %v285_v37, %v197_v17  ;;  %v350_v22 = vmul.f32 %v325_v51, %v229_v18 }
  0xf3   :  { %539 = vst [vmem:[#allocation2 + $0x18] sm:$0xff] %v515_v19   ;;  %543 = vst [vmem:[#allocation2 + $0x38] sm:$0xff] %v535_v20   ;;  %v510_v23 = vpack.c.bf16 %v342_v21, %v341_v15  ;;  %v530_v24 = vpack.c.bf16 %v350_v22, %v349_v16 }
  0xf5   :  { %538 = vst [vmem:[#allocation2 + $0x10] sm:$0xff] %v510_v23   ;;  %542 = vst [vmem:[#allocation2 + $0x30] sm:$0xff] %v530_v24  }
  0xf6   :  { %641 = shalt.err (!%p638_p4)
}
  0xf7   :  { %s654_s22 = smov 64   ;;  %s655_s1 = smov 4  }
  0xf8   :  { %444 = dma.vmem_to_hbm [thread:$0]  %s439_s2, 1024, %s778_s3, [#allocation3], %s654_s22, %s654_s22, %s655_s1  }
  0xf9   :  { %650 = dma.done.wait [#allocation3], 1024  }
  0xfa   :  { %651 = vsyncadd [#allocation3], 4294966272 }
  0xfb   :  { %448 = vsyncpa [#allocation3], 1 }

</bundles_post_ra>
